<compile_context>
chip_gen: v7x
topology: tpu7x:2x2x1
jax: 0.10.0
libtpu: 0.0.40
codegen_flags: <defaults>
</compile_context>

<pallas_src>
import functools

import jax
import jax.numpy as jnp
from jax import lax
from jax.experimental import pallas as pl
from jax.experimental.pallas import tpu as pltpu


def _round_up(x, m):
    return (x + m - 1) // m * m


def _fold_lanes_to_channels(v, Wout, Cout):
    """[1, Wout*Cout] with lane index w*Cout + co  ->  [1, Cout] (static slices + VPU adds)."""
    out = v[:, 0:Cout]
    for w in range(1, Wout):
        out = out + v[:, w * Cout:(w + 1) * Cout]
    return out


# -----------------------------------------------------------------------------
# Fused kernel: grid=(num_batch_tiles,).  Each step:
#   conv for one batch tile (kh banded matmuls, M = B_tile*Hout_pad rows)
#   -> write into the VMEM-resident output slab (single HBM writeback at the end)
#   -> accumulate [8, L] partial sums with VPU adds.
# Last step: exact centered variance from the resident slab, BN scale/shift +
# ReLU in place.
# -----------------------------------------------------------------------------
def _fused_conv_bn_relu_kernel(xp_ref, w_ref, g_ref, b_ref, o_ref, sum8_ref, *,
                               kh, stride, B_tile, Hp_pad, Hout, Hout_pad,
                               Wout, Cout, count, pad_positions, eps):
    t = pl.program_id(0)
    last = pl.num_programs(0) - 1
    K = xp_ref.shape[-1]
    L = Wout * Cout
    R = B_tile * Hout_pad            # output rows produced by this step
    n_rows = B_tile * Hp_pad         # input rows consumed by this step

    @pl.when(t == 0)
    def _init():
        sum8_ref[...] = jnp.zeros_like(sum8_ref)

    # ---- conv for this batch tile: kh banded matmuls over row-shifted input ----
    xp = xp_ref[...]                                     # [B_tile*Hp_pad, K]
    acc = None
    for i in range(kh):                                  # static unroll, kh is tiny
        if stride == 1:
            # Sublane roll (XLU slot) + 8-aligned slice/reshape views; avoids
            # sublane-misaligned slice relayouts.
            xs = xp if i == 0 else pltpu.roll(xp, shift=n_rows - i, axis=0)
            rows = xs.reshape(B_tile, Hp_pad, K)[:, :Hout_pad, :].reshape(R, K)
        else:
            # TODO(synk): stride > 1 falls back to a strided sublane slice
            # (relayout copy, kh per step); pre-split rows in the wrapper if this
            # ever shows up in profiles.
            rows = (xp.reshape(B_tile, Hp_pad, K)
                    [:, i:i + stride * (Hout_pad - 1) + 1:stride, :]
                    .reshape(R, K))
        part = jnp.dot(rows, w_ref[i], preferred_element_type=jnp.float32)
        acc = part if acc is None else acc + part        # [R, L]

    if Hout_pad != Hout:
        # Zero the alignment-pad output rows so they cannot pollute the BN stats.
        rid = lax.broadcasted_iota(jnp.int32, (R, 1), 0) % Hout_pad
        acc = jnp.where(rid < Hout, acc, 0.0)

    # Stash y for this tile in the resident VMEM output block.  Store is
    # sublane-aligned (R % 8 == 0) and lane-dense (L is a multiple of 128 here).
    row0 = pl.multiple_of(t * R, 8)
    o_ref[pl.ds(row0, R), :] = acc

    # ---- BN batch statistics: per-step partial sums stay on the VPU ------------
    part8 = acc[0:8, :]
    for g in range(1, R // 8):
        part8 = part8 + acc[g * 8:(g + 1) * 8, :]
    sum8_ref[...] += part8                               # [8, L]

    # ---- final step: BN scale/shift + ReLU epilogue over the resident slab -----
    @pl.when(t == last)
    def _finalize():
        cnt = float(count)
        lane_sum = jnp.sum(sum8_ref[...], axis=0, keepdims=True)       # [1, L] (one XLU reduce)
        mean_c = _fold_lanes_to_channels(lane_sum, Wout, Cout) / cnt   # [1, Cout]

        # Per-channel -> per-lane broadcast via an in-register 0/1 matrix (no HBM
        # constants); lane l belongs to channel l % Cout.
        co = lax.broadcasted_iota(jnp.int32, (Cout, L), 0)
        ln = lax.broadcasted_iota(jnp.int32, (Cout, L), 1)
        selT = (ln % Cout == co).astype(jnp.float32)                   # [Cout, L]
        mean_l = jnp.dot(mean_c, selT, preferred_element_type=jnp.float32)  # [1, L]

        # Centered second pass over the resident conv output: exact variance.
        d = o_ref[...] - mean_l                                        # [N*Hout_pad, L]
        lane_sq = jnp.sum(d * d, axis=0, keepdims=True)                # [1, L]
        sq_c = _fold_lanes_to_channels(lane_sq, Wout, Cout)            # [1, Cout]
        if pad_positions:
            # Zeroed alignment-pad rows contributed (0 - mean)^2 each; remove exactly.
            sq_c = sq_c - float(pad_positions) * mean_c * mean_c
        var_c = jnp.maximum(sq_c / cnt, 0.0)

        scale_c = g_ref[...] * lax.rsqrt(var_c + eps)                  # [1, Cout]
        scale_l = jnp.dot(scale_c, selT, preferred_element_type=jnp.float32)
        beta_l = jnp.dot(b_ref[...], selT, preferred_element_type=jnp.float32)
        o_ref[...] = jnp.maximum(d * scale_l + beta_l, 0.0)


def _make_banded_weights(weight, Wout, W, stride, padding, dtype):
    """[Cout, Cin, kh, kw] -> [kh, W*Cin, Wout*Cout] Toeplitz-banded along W.

    The W-direction zero padding is absorbed here (band rows that would multiply
    padded-out columns are dropped), so the wrapper never pads W:
        y[h, w*Cout+co] = sum_i  x_rows_i[h] @ wbig[i]
    with x_rows_i the (H-padded) input rows shifted by kernel row i.
    """
    Cout, Cin, kh, kw = weight.shape
    Wp = W + 2 * padding
    w_t = weight.transpose(2, 3, 1, 0).astype(jnp.float32)     # [kh, kw, Cin, Cout]
    wbig = jnp.zeros((kh, Wp, Cin, Wout, Cout), jnp.float32)
    ws = jnp.arange(Wout)
    for i in range(kh):
        for j in range(kw):
            wbig = wbig.at[i, stride * ws + j, :, ws, :].set(w_t[i, j])
    wbig = wbig[:, padding:padding + W]                        # drop W-pad columns
    return wbig.reshape(kh, W * Cin, Wout * Cout).astype(dtype)


def conv_block_forward(x, weight, bias, gamma, beta, *, stride, padding,
                       eps=1e-5, compute_dtype=jnp.float32):
    """x: [N, Cin, H, W] (NCHW). weight: [Cout, Cin, kh, kw]. Returns NCHW.

    `bias` is accepted for API parity but intentionally unused: under
    training-mode BatchNorm the conv bias is removed exactly by the batch-mean
    subtraction, so dropping it leaves the returned tensor unchanged.  Set
    compute_dtype=jnp.bfloat16 on v6e/v7x for MXU throughput at larger shapes
    (accumulation stays f32 via preferred_element_type).
    """
    del bias  # mathematically a no-op before train-mode BN (see docstring)

    N, Cin, H, W = x.shape
    Cout, _, kh, kw = weight.shape
    Hp, Wp = H + 2 * padding, W + 2 * padding
    Hout = (Hp - kh) // stride + 1
    Wout = (Wp - kw) // stride + 1
    L = Wout * Cout                  # lane width of the fused layout (128 here)
    K = W * Cin                      # contraction width (W padding lives in wbig)

    # Sublane-aligned padded row counts (stores stay unmasked, reshapes stay views).
    Hout_pad = _round_up(Hout, 8)
    Hp_pad = _round_up(max(Hp, stride * (Hout_pad - 1) + kh), 8)

    # Batch tile: aim for M = B_tile*Hout_pad ~ 256 MXU rows; must divide N.
    target = max(1, 256 // Hout_pad)
    B_tile = 1
    for d in range(1, N + 1):
        if N % d == 0 and d <= target:
            B_tile = d
    num_tiles = N // B_tile

    # NCHW -> NHWC, flattened to [N*Hp_pad, W*Cin]; only H is zero-padded here
    # (top `padding` rows + bottom alignment rows), W padding is inside wbig.
    # TODO(synk): the NCHW->NHWC transpose + H-pad still round-trip HBM once; they
    #             could be folded into the kernel with an in-VMEM memset + DMA.
    x_nhwc = x.transpose(0, 2, 3, 1).reshape(N, H, K)
    xp = jnp.pad(x_nhwc, ((0, 0), (padding, Hp_pad - H - padding), (0, 0)))
    xp2d = xp.reshape(N * Hp_pad, K).astype(compute_dtype)

    wbig = _make_banded_weights(weight, Wout, W, stride, padding, compute_dtype)
    g_row = gamma.reshape(1, Cout).astype(jnp.float32)
    b_row = beta.reshape(1, Cout).astype(jnp.float32)

    kernel = functools.partial(
        _fused_conv_bn_relu_kernel,
        kh=kh, stride=stride, B_tile=B_tile, Hp_pad=Hp_pad,
        Hout=Hout, Hout_pad=Hout_pad, Wout=Wout, Cout=Cout,
        count=N * Hout * Wout, pad_positions=N * (Hout_pad - Hout) * Wout, eps=eps)

    itemsize = jnp.dtype(compute_dtype).itemsize
    cost = pl.CostEstimate(
        flops=2 * N * Hout * Wout * kh * kw * Cin * Cout
              + 6 * N * Hout_pad * Wout * Cout,
        transcendentals=Cout,
        bytes_accessed=(xp2d.size * itemsize + wbig.size * itemsize
                        + N * Hout_pad * L * 4 + 2 * Cout * 4))

    out2d = pl.pallas_call(
        kernel,
        out_shape=jax.ShapeDtypeStruct((N * Hout_pad, L), jnp.float32),
        grid=(num_tiles,),
        in_specs=[
            pl.BlockSpec((B_tile * Hp_pad, K), lambda t: (t, 0)),    # batch tile of rows
            pl.BlockSpec((kh, K, L), lambda t: (0, 0, 0)),           # banded weights (resident)
            pl.BlockSpec((1, Cout), lambda t: (0, 0)),               # gamma
            pl.BlockSpec((1, Cout), lambda t: (0, 0)),               # beta
        ],
        # Whole output stays resident in VMEM across the grid (single writeback
        # after the BN+ReLU epilogue).
        out_specs=pl.BlockSpec((N * Hout_pad, L), lambda t: (0, 0)),
        scratch_shapes=[pltpu.VMEM((8, L), jnp.float32)],            # running [8, L] sums
        compiler_params=pltpu.CompilerParams(
            dimension_semantics=("arbitrary",),       # stats / output carried across steps
            vmem_limit_bytes=32 * 1024 * 1024),       # explicit (v5e scoped default is 16 MiB)
        cost_estimate=cost,
    )(xp2d, wbig, g_row, b_row)

    # [N*Hout_pad, L] -> NCHW (drop alignment-pad rows); wrapper-side plumbing.
    out = out2d.reshape(N, Hout_pad, Wout, Cout)[:, :Hout]
    return out.transpose(0, 3, 1, 2)


def _reference(x, weight, bias, gamma, beta, *, stride, padding, eps=1e-5):
    """Pure-JAX reference matching PyTorch ConvBlock forward (train-mode BN)."""
    y = lax.conv_general_dilated(
        x, weight, window_strides=(stride, stride),
        padding=((padding, padding), (padding, padding)),
        dimension_numbers=("NCHW", "OIHW", "NCHW"))
    y = y + bias.reshape(1, -1, 1, 1)
    mean = jnp.mean(y, axis=(0, 2, 3), keepdims=True)
    var = jnp.mean((y - mean) ** 2, axis=(0, 2, 3), keepdims=True)
    y = (y - mean) / jnp.sqrt(var + eps)
    y = y * gamma.reshape(1, -1, 1, 1) + beta.reshape(1, -1, 1, 1)
    return jnp.maximum(y, 0.0)


if __name__ == "__main__":
    # ConvBlock(in_channels=4, out_channels=8, kernel_size=3, stride=1, padding=1)
    in_channels, out_channels, kernel_size, stride, padding = 4, 8, 3, 1, 1
    N, H, W = 2, 16, 16

    key = jax.random.PRNGKey(0)
    kx, kwt, kb = jax.random.split(key, 3)

    x = jax.random.normal(kx, (N, in_channels, H, W), dtype=jnp.float32)

    # Deterministic parameter init (PyTorch-style uniform bound = 1/sqrt(fan_in)).
    fan_in = in_channels * kernel_size * kernel_size
    bound = 1.0 / (fan_in ** 0.5)
    weight = jax.random.uniform(
        kwt, (out_channels, in_channels, kernel_size, kernel_size),
        minval=-bound, maxval=bound, dtype=jnp.float32)
    bias = jax.random.uniform(kb, (out_channels,), minval=-bound, maxval=bound,
                              dtype=jnp.float32)
    gamma = jnp.ones((out_channels,), jnp.float32)   # BatchNorm2d weight init
    beta = jnp.zeros((out_channels,), jnp.float32)   # BatchNorm2d bias init

    out = conv_block_forward(x, weight, bias, gamma, beta,
                             stride=stride, padding=padding)
    out = jax.block_until_ready(out)

    ref = _reference(x, weight, bias, gamma, beta, stride=stride, padding=padding)
    assert out.shape == (N, out_channels, H, W)
    err = float(jnp.max(jnp.abs(out - ref)))
    assert jnp.allclose(out, ref, atol=1e-4, rtol=1e-4), (
        f"mismatch vs reference (max abs err {err})")

    print("KERNEL_OK")
</pallas_src>

<mosaic_0001>
module attributes {stable_mosaic.version = 11 : i64} {
  func.func @_fused_conv_bn_relu_kernel(%arg0: i32, %arg1: memref<48x64xf32, #tpu.memory_space<vmem>>, %arg2: memref<3x64x128xf32, #tpu.memory_space<vmem>>, %arg3: memref<1x8xf32, #tpu.memory_space<vmem>>, %arg4: memref<1x8xf32, #tpu.memory_space<vmem>>, %arg5: memref<32x128xf32, #tpu.memory_space<vmem>>, %arg6: memref<8x128xf32, #tpu.memory_space<vmem>>) attributes {dimension_semantics = [#tpu.dimension_semantics<arbitrary>], iteration_bounds = array<i64: 1>, scalar_prefetch = 0 : i64, scratch_operands = 1 : i64, tpu.core_type = #tpu.core_type<tc>, window_params = [{transform_indices = @transform_0, window_bounds = array<i64: 48, 64>}, {pipeline_mode = #tpu.pipeline_mode<synchronous>, transform_indices = @transform_1, window_bounds = array<i64: 3, 64, 128>}, {pipeline_mode = #tpu.pipeline_mode<synchronous>, transform_indices = @transform_2, window_bounds = array<i64: 1, 8>}, {pipeline_mode = #tpu.pipeline_mode<synchronous>, transform_indices = @transform_3, window_bounds = array<i64: 1, 8>}, {pipeline_mode = #tpu.pipeline_mode<synchronous>, transform_indices = @transform_4, window_bounds = array<i64: 32, 128>}]} {
    %c0_i32 = arith.constant 0 : i32
    %0 = arith.cmpi eq, %arg0, %c0_i32 : i32
    %1 = arith.extui %0 : i1 to i32
    %c0_i32_0 = arith.constant 0 : i32
    %2 = arith.cmpi ne, %1, %c0_i32_0 : i32
    scf.if %2 {
      %cst_18 = arith.constant 0.000000e+00 : f32
      %43 = vector.broadcast %cst_18 : f32 to vector<8x128xf32>
      %c0_19 = arith.constant 0 : index
      %c0_20 = arith.constant 0 : index
      %44 = vector.load %arg6[%c0_19, %c0_20] : memref<8x128xf32, #tpu.memory_space<vmem>>, vector<8x128xf32>
      tpu.vector_store %arg6[%c0_19, %c0_20], %43 {strides = array<i32>} : memref<8x128xf32, #tpu.memory_space<vmem>>, vector<8x128xf32>,
    } else {
    }
    %c0 = arith.constant 0 : index
    %c0_1 = arith.constant 0 : index
    %3 = vector.load %arg1[%c0, %c0_1] : memref<48x64xf32, #tpu.memory_space<vmem>>, vector<48x64xf32>
    %4 = vector.shape_cast %3 : vector<48x64xf32> to vector<2x24x64xf32>
    %5 = vector.extract_strided_slice %4 {offsets = [0, 0, 0], sizes = [2, 16, 64], strides = [1, 1, 1]} : vector<2x24x64xf32> to vector<2x16x64xf32>
    %6 = vector.shape_cast %5 : vector<2x16x64xf32> to vector<32x64xf32>
    %c0_2 = arith.constant 0 : index
    %c0_3 = arith.constant 0 : index
    %c0_4 = arith.constant 0 : index
    %7 = vector.load %arg2[%c0_2, %c0_3, %c0_4] : memref<3x64x128xf32, #tpu.memory_space<vmem>>, vector<1x64x128xf32>
    %8 = vector.shape_cast %7 : vector<1x64x128xf32> to vector<64x128xf32>
    %cst = arith.constant dense<0.000000e+00> : vector<32x128xf32>
    %9 = tpu.matmul %6, %8, %cst {dimension_numbers = #tpu.dot_dimension_numbers<[1], [0], [0], [1], [0, 0, 1, 1], [], []>} : vector<32x64xf32>, vector<64x128xf32>, vector<32x128xf32> -> vector<32x128xf32>
    %c47_i32 = arith.constant 47 : i32
    %10 = tpu.dynamic_rotate %3 by %c47_i32 dim 0 : vector<48x64xf32>, i32 -> vector<48x64xf32>
    %11 = vector.shape_cast %10 : vector<48x64xf32> to vector<2x24x64xf32>
    %12 = vector.extract_strided_slice %11 {offsets = [0, 0, 0], sizes = [2, 16, 64], strides = [1, 1, 1]} : vector<2x24x64xf32> to vector<2x16x64xf32>
    %13 = vector.shape_cast %12 : vector<2x16x64xf32> to vector<32x64xf32>
    %c1 = arith.constant 1 : index
    %c0_5 = arith.constant 0 : index
    %c0_6 = arith.constant 0 : index
    %14 = vector.load %arg2[%c1, %c0_5, %c0_6] : memref<3x64x128xf32, #tpu.memory_space<vmem>>, vector<1x64x128xf32>
    %15 = vector.shape_cast %14 : vector<1x64x128xf32> to vector<64x128xf32>
    %cst_7 = arith.constant dense<0.000000e+00> : vector<32x128xf32>
    %16 = tpu.matmul %13, %15, %cst_7 {dimension_numbers = #tpu.dot_dimension_numbers<[1], [0], [0], [1], [0, 0, 1, 1], [], []>} : vector<32x64xf32>, vector<64x128xf32>, vector<32x128xf32> -> vector<32x128xf32>
    %17 = arith.addf %9, %16 : vector<32x128xf32>
    %c46_i32 = arith.constant 46 : i32
    %18 = tpu.dynamic_rotate %3 by %c46_i32 dim 0 : vector<48x64xf32>, i32 -> vector<48x64xf32>
    %19 = vector.shape_cast %18 : vector<48x64xf32> to vector<2x24x64xf32>
    %20 = vector.extract_strided_slice %19 {offsets = [0, 0, 0], sizes = [2, 16, 64], strides = [1, 1, 1]} : vector<2x24x64xf32> to vector<2x16x64xf32>
    %21 = vector.shape_cast %20 : vector<2x16x64xf32> to vector<32x64xf32>
    %c2 = arith.constant 2 : index
    %c0_8 = arith.constant 0 : index
    %c0_9 = arith.constant 0 : index
    %22 = vector.load %arg2[%c2, %c0_8, %c0_9] : memref<3x64x128xf32, #tpu.memory_space<vmem>>, vector<1x64x128xf32>
    %23 = vector.shape_cast %22 : vector<1x64x128xf32> to vector<64x128xf32>
    %cst_10 = arith.constant dense<0.000000e+00> : vector<32x128xf32>
    %24 = tpu.matmul %21, %23, %cst_10 {dimension_numbers = #tpu.dot_dimension_numbers<[1], [0], [0], [1], [0, 0, 1, 1], [], []>} : vector<32x64xf32>, vector<64x128xf32>, vector<32x128xf32> -> vector<32x128xf32>
    %25 = arith.addf %17, %24 : vector<32x128xf32>
    %c32_i32 = arith.constant 32 : i32
    %26 = arith.muli %arg0, %c32_i32 : i32
    %27 = tpu.assume_multiple %26, 8 : i32
    %28 = arith.index_cast %27 : i32 to index
    %c0_11 = arith.constant 0 : index
    %29 = vector.load %arg5[%28, %c0_11] : memref<32x128xf32, #tpu.memory_space<vmem>>, vector<32x128xf32>
    tpu.vector_store %arg5[%28, %c0_11], %25 {strides = array<i32>} : memref<32x128xf32, #tpu.memory_space<vmem>>, vector<32x128xf32>,
    %30 = vector.extract_strided_slice %25 {offsets = [0, 0], sizes = [8, 128], strides = [1, 1]} : vector<32x128xf32> to vector<8x128xf32>
    %31 = vector.extract_strided_slice %25 {offsets = [8, 0], sizes = [8, 128], strides = [1, 1]} : vector<32x128xf32> to vector<8x128xf32>
    %32 = arith.addf %30, %31 : vector<8x128xf32>
    %33 = vector.extract_strided_slice %25 {offsets = [16, 0], sizes = [8, 128], strides = [1, 1]} : vector<32x128xf32> to vector<8x128xf32>
    %34 = arith.addf %32, %33 : vector<8x128xf32>
    %35 = vector.extract_strided_slice %25 {offsets = [24, 0], sizes = [8, 128], strides = [1, 1]} : vector<32x128xf32> to vector<8x128xf32>
    %36 = arith.addf %34, %35 : vector<8x128xf32>
    %c0_12 = arith.constant 0 : index
    %c0_13 = arith.constant 0 : index
    %37 = vector.load %arg6[%c0_12, %c0_13] : memref<8x128xf32, #tpu.memory_space<vmem>>, vector<8x128xf32>
    %38 = arith.addf %37, %36 : vector<8x128xf32>
    %c0_14 = arith.constant 0 : index
    %c0_15 = arith.constant 0 : index
    %39 = vector.load %arg6[%c0_14, %c0_15] : memref<8x128xf32, #tpu.memory_space<vmem>>, vector<8x128xf32>
    tpu.vector_store %arg6[%c0_14, %c0_15], %38 {strides = array<i32>} : memref<8x128xf32, #tpu.memory_space<vmem>>, vector<8x128xf32>,
    %c0_i32_16 = arith.constant 0 : i32
    %40 = arith.cmpi eq, %arg0, %c0_i32_16 : i32
    %41 = arith.extui %40 : i1 to i32
    %c0_i32_17 = arith.constant 0 : i32
    %42 = arith.cmpi ne, %41, %c0_i32_17 : i32
    scf.if %42 {
      %c0_18 = arith.constant 0 : index
      %c0_19 = arith.constant 0 : index
      %43 = vector.load %arg6[%c0_18, %c0_19] : memref<8x128xf32, #tpu.memory_space<vmem>>, vector<8x128xf32>
      %cst_20 = arith.constant dense<0.000000e+00> : vector<128xf32>
      %44 = vector.multi_reduction <add>, %43, %cst_20 [0] : vector<8x128xf32> to vector<128xf32>
      %45 = vector.shape_cast %44 : vector<128xf32> to vector<1x128xf32>
      %46 = vector.extract_strided_slice %45 {offsets = [0, 0], sizes = [1, 8], strides = [1, 1]} : vector<1x128xf32> to vector<1x8xf32>
      %47 = vector.extract_strided_slice %45 {offsets = [0, 8], sizes = [1, 8], strides = [1, 1]} : vector<1x128xf32> to vector<1x8xf32>
      %48 = arith.addf %46, %47 : vector<1x8xf32>
      %49 = vector.extract_strided_slice %45 {offsets = [0, 16], sizes = [1, 8], strides = [1, 1]} : vector<1x128xf32> to vector<1x8xf32>
      %50 = arith.addf %48, %49 : vector<1x8xf32>
      %51 = vector.extract_strided_slice %45 {offsets = [0, 24], sizes = [1, 8], strides = [1, 1]} : vector<1x128xf32> to vector<1x8xf32>
      %52 = arith.addf %50, %51 : vector<1x8xf32>
      %53 = vector.extract_strided_slice %45 {offsets = [0, 32], sizes = [1, 8], strides = [1, 1]} : vector<1x128xf32> to vector<1x8xf32>
      %54 = arith.addf %52, %53 : vector<1x8xf32>
      %55 = vector.extract_strided_slice %45 {offsets = [0, 40], sizes = [1, 8], strides = [1, 1]} : vector<1x128xf32> to vector<1x8xf32>
      %56 = arith.addf %54, %55 : vector<1x8xf32>
      %57 = vector.extract_strided_slice %45 {offsets = [0, 48], sizes = [1, 8], strides = [1, 1]} : vector<1x128xf32> to vector<1x8xf32>
      %58 = arith.addf %56, %57 : vector<1x8xf32>
      %59 = vector.extract_strided_slice %45 {offsets = [0, 56], sizes = [1, 8], strides = [1, 1]} : vector<1x128xf32> to vector<1x8xf32>
      %60 = arith.addf %58, %59 : vector<1x8xf32>
      %61 = vector.extract_strided_slice %45 {offsets = [0, 64], sizes = [1, 8], strides = [1, 1]} : vector<1x128xf32> to vector<1x8xf32>
      %62 = arith.addf %60, %61 : vector<1x8xf32>
      %63 = vector.extract_strided_slice %45 {offsets = [0, 72], sizes = [1, 8], strides = [1, 1]} : vector<1x128xf32> to vector<1x8xf32>
      %64 = arith.addf %62, %63 : vector<1x8xf32>
      %65 = vector.extract_strided_slice %45 {offsets = [0, 80], sizes = [1, 8], strides = [1, 1]} : vector<1x128xf32> to vector<1x8xf32>
      %66 = arith.addf %64, %65 : vector<1x8xf32>
      %67 = vector.extract_strided_slice %45 {offsets = [0, 88], sizes = [1, 8], strides = [1, 1]} : vector<1x128xf32> to vector<1x8xf32>
      %68 = arith.addf %66, %67 : vector<1x8xf32>
      %69 = vector.extract_strided_slice %45 {offsets = [0, 96], sizes = [1, 8], strides = [1, 1]} : vector<1x128xf32> to vector<1x8xf32>
      %70 = arith.addf %68, %69 : vector<1x8xf32>
      %71 = vector.extract_strided_slice %45 {offsets = [0, 104], sizes = [1, 8], strides = [1, 1]} : vector<1x128xf32> to vector<1x8xf32>
      %72 = arith.addf %70, %71 : vector<1x8xf32>
      %73 = vector.extract_strided_slice %45 {offsets = [0, 112], sizes = [1, 8], strides = [1, 1]} : vector<1x128xf32> to vector<1x8xf32>
      %74 = arith.addf %72, %73 : vector<1x8xf32>
      %75 = vector.extract_strided_slice %45 {offsets = [0, 120], sizes = [1, 8], strides = [1, 1]} : vector<1x128xf32> to vector<1x8xf32>
      %76 = arith.addf %74, %75 : vector<1x8xf32>
      %cst_21 = arith.constant 5.120000e+02 : f32
      %77 = vector.broadcast %cst_21 : f32 to vector<1x8xf32>
      %78 = arith.divf %76, %77 : vector<1x8xf32>
      %79 = tpu.iota {dimensions = array<i32: 0>} : vector<8x128xi32>
      %80 = tpu.iota {dimensions = array<i32: 1>} : vector<8x128xi32>
      %c8_i32 = arith.constant 8 : i32
      %c0_i32_22 = arith.constant 0 : i32
      %81 = arith.cmpi eq, %c8_i32, %c0_i32_22 : i32
      %c1_i32 = arith.constant 1 : i32
      %82 = arith.select %81, %c1_i32, %c8_i32 : i32
      %83 = vector.broadcast %82 : i32 to vector<8x128xi32>
      %84 = arith.remsi %80, %83 : vector<8x128xi32>
      %c0_i32_23 = arith.constant 0 : i32
      %85 = vector.broadcast %c0_i32_23 : i32 to vector<8x128xi32>
      %86 = arith.cmpi ne, %84, %85 : vector<8x128xi32>
      %c0_i32_24 = arith.constant 0 : i32
      %87 = vector.broadcast %c0_i32_24 : i32 to vector<8x128xi32>
      %88 = arith.cmpi slt, %84, %87 : vector<8x128xi32>
      %c0_i32_25 = arith.constant 0 : i32
      %89 = arith.cmpi slt, %82, %c0_i32_25 : i32
      %90 = vector.broadcast %89 : i1 to vector<8x128xi1>
      %91 = vector.broadcast %90 : vector<8x128xi1> to vector<8x128xi1>
      %92 = arith.xori %88, %91 : vector<8x128xi1>
      %93 = arith.andi %92, %86 : vector<8x128xi1>
      %94 = vector.broadcast %82 : i32 to vector<8x128xi32>
      %95 = arith.addi %84, %94 : vector<8x128xi32>
      %96 = arith.select %93, %95, %84 : vector<8x128xi1>, vector<8x128xi32>
      %97 = arith.cmpi eq, %96, %79 : vector<8x128xi32>
      %98 = arith.extui %97 : vector<8x128xi1> to vector<8x128xi32>
      %99 = arith.sitofp %98 : vector<8x128xi32> to vector<8x128xf32>
      %cst_26 = arith.constant dense<0.000000e+00> : vector<1x128xf32>
      %100 = tpu.matmul %78, %99, %cst_26 {dimension_numbers = #tpu.dot_dimension_numbers<[1], [0], [0], [1], [0, 0, 1, 1], [], []>} : vector<1x8xf32>, vector<8x128xf32>, vector<1x128xf32> -> vector<1x128xf32>
      %c0_27 = arith.constant 0 : index
      %c0_28 = arith.constant 0 : index
      %101 = vector.load %arg5[%c0_27, %c0_28] : memref<32x128xf32, #tpu.memory_space<vmem>>, vector<32x128xf32>
      %102 = vector.broadcast %100 : vector<1x128xf32> to vector<32x128xf32>
      %103 = arith.subf %101, %102 : vector<32x128xf32>
      %104 = arith.mulf %103, %103 : vector<32x128xf32>
      %cst_29 = arith.constant dense<0.000000e+00> : vector<128xf32>
      %105 = vector.multi_reduction <add>, %104, %cst_29 [0] : vector<32x128xf32> to vector<128xf32>
      %106 = vector.shape_cast %105 : vector<128xf32> to vector<1x128xf32>
      %107 = vector.extract_strided_slice %106 {offsets = [0, 0], sizes = [1, 8], strides = [1, 1]} : vector<1x128xf32> to vector<1x8xf32>
      %108 = vector.extract_strided_slice %106 {offsets = [0, 8], sizes = [1, 8], strides = [1, 1]} : vector<1x128xf32> to vector<1x8xf32>
      %109 = arith.addf %107, %108 : vector<1x8xf32>
      %110 = vector.extract_strided_slice %106 {offsets = [0, 16], sizes = [1, 8], strides = [1, 1]} : vector<1x128xf32> to vector<1x8xf32>
      %111 = arith.addf %109, %110 : vector<1x8xf32>
      %112 = vector.extract_strided_slice %106 {offsets = [0, 24], sizes = [1, 8], strides = [1, 1]} : vector<1x128xf32> to vector<1x8xf32>
      %113 = arith.addf %111, %112 : vector<1x8xf32>
      %114 = vector.extract_strided_slice %106 {offsets = [0, 32], sizes = [1, 8], strides = [1, 1]} : vector<1x128xf32> to vector<1x8xf32>
      %115 = arith.addf %113, %114 : vector<1x8xf32>
      %116 = vector.extract_strided_slice %106 {offsets = [0, 40], sizes = [1, 8], strides = [1, 1]} : vector<1x128xf32> to vector<1x8xf32>
      %117 = arith.addf %115, %116 : vector<1x8xf32>
      %118 = vector.extract_strided_slice %106 {offsets = [0, 48], sizes = [1, 8], strides = [1, 1]} : vector<1x128xf32> to vector<1x8xf32>
      %119 = arith.addf %117, %118 : vector<1x8xf32>
      %120 = vector.extract_strided_slice %106 {offsets = [0, 56], sizes = [1, 8], strides = [1, 1]} : vector<1x128xf32> to vector<1x8xf32>
      %121 = arith.addf %119, %120 : vector<1x8xf32>
      %122 = vector.extract_strided_slice %106 {offsets = [0, 64], sizes = [1, 8], strides = [1, 1]} : vector<1x128xf32> to vector<1x8xf32>
      %123 = arith.addf %121, %122 : vector<1x8xf32>
      %124 = vector.extract_strided_slice %106 {offsets = [0, 72], sizes = [1, 8], strides = [1, 1]} : vector<1x128xf32> to vector<1x8xf32>
      %125 = arith.addf %123, %124 : vector<1x8xf32>
      %126 = vector.extract_strided_slice %106 {offsets = [0, 80], sizes = [1, 8], strides = [1, 1]} : vector<1x128xf32> to vector<1x8xf32>
      %127 = arith.addf %125, %126 : vector<1x8xf32>
      %128 = vector.extract_strided_slice %106 {offsets = [0, 88], sizes = [1, 8], strides = [1, 1]} : vector<1x128xf32> to vector<1x8xf32>
      %129 = arith.addf %127, %128 : vector<1x8xf32>
      %130 = vector.extract_strided_slice %106 {offsets = [0, 96], sizes = [1, 8], strides = [1, 1]} : vector<1x128xf32> to vector<1x8xf32>
      %131 = arith.addf %129, %130 : vector<1x8xf32>
      %132 = vector.extract_strided_slice %106 {offsets = [0, 104], sizes = [1, 8], strides = [1, 1]} : vector<1x128xf32> to vector<1x8xf32>
      %133 = arith.addf %131, %132 : vector<1x8xf32>
      %134 = vector.extract_strided_slice %106 {offsets = [0, 112], sizes = [1, 8], strides = [1, 1]} : vector<1x128xf32> to vector<1x8xf32>
      %135 = arith.addf %133, %134 : vector<1x8xf32>
      %136 = vector.extract_strided_slice %106 {offsets = [0, 120], sizes = [1, 8], strides = [1, 1]} : vector<1x128xf32> to vector<1x8xf32>
      %137 = arith.addf %135, %136 : vector<1x8xf32>
      %cst_30 = arith.constant 5.120000e+02 : f32
      %138 = vector.broadcast %cst_30 : f32 to vector<1x8xf32>
      %139 = arith.divf %137, %138 : vector<1x8xf32>
      %cst_31 = arith.constant 0.000000e+00 : f32
      %140 = vector.broadcast %cst_31 : f32 to vector<1x8xf32>
      %141 = arith.maximumf %139, %140 : vector<1x8xf32>
      %c0_32 = arith.constant 0 : index
      %c0_33 = arith.constant 0 : index
      %142 = vector.load %arg3[%c0_32, %c0_33] : memref<1x8xf32, #tpu.memory_space<vmem>>, vector<1x8xf32>
      %cst_34 = arith.constant 9.99999974E-6 : f32
      %143 = vector.broadcast %cst_34 : f32 to vector<1x8xf32>
      %144 = arith.addf %141, %143 : vector<1x8xf32>
      %145 = math.rsqrt %144 : vector<1x8xf32>
      %146 = arith.mulf %142, %145 : vector<1x8xf32>
      %cst_35 = arith.constant dense<0.000000e+00> : vector<1x128xf32>
      %147 = tpu.matmul %146, %99, %cst_35 {dimension_numbers = #tpu.dot_dimension_numbers<[1], [0], [0], [1], [0, 0, 1, 1], [], []>} : vector<1x8xf32>, vector<8x128xf32>, vector<1x128xf32> -> vector<1x128xf32>
      %c0_36 = arith.constant 0 : index
      %c0_37 = arith.constant 0 : index
      %148 = vector.load %arg4[%c0_36, %c0_37] : memref<1x8xf32, #tpu.memory_space<vmem>>, vector<1x8xf32>
      %cst_38 = arith.constant dense<0.000000e+00> : vector<1x128xf32>
      %149 = tpu.matmul %148, %99, %cst_38 {dimension_numbers = #tpu.dot_dimension_numbers<[1], [0], [0], [1], [0, 0, 1, 1], [], []>} : vector<1x8xf32>, vector<8x128xf32>, vector<1x128xf32> -> vector<1x128xf32>
      %150 = vector.broadcast %147 : vector<1x128xf32> to vector<32x128xf32>
      %151 = arith.mulf %103, %150 : vector<32x128xf32>
      %152 = vector.broadcast %149 : vector<1x128xf32> to vector<32x128xf32>
      %153 = arith.addf %151, %152 : vector<32x128xf32>
      %cst_39 = arith.constant 0.000000e+00 : f32
      %154 = vector.broadcast %cst_39 : f32 to vector<32x128xf32>
      %155 = arith.maximumf %153, %154 : vector<32x128xf32>
      %c0_40 = arith.constant 0 : index
      %c0_41 = arith.constant 0 : index
      %156 = vector.load %arg5[%c0_40, %c0_41] : memref<32x128xf32, #tpu.memory_space<vmem>>, vector<32x128xf32>
      tpu.vector_store %arg5[%c0_40, %c0_41], %155 {strides = array<i32>} : memref<32x128xf32, #tpu.memory_space<vmem>>, vector<32x128xf32>,
    } else {
    }
    return
  }
  func.func @transform_0(%arg0: i32) -> (i32, i32) {
    %c0_i32 = arith.constant 0 : i32
    %c0_i32_0 = arith.constant 0 : i32
    return %arg0, %c0_i32 : i32, i32
  }
  func.func @transform_1(%arg0: i32) -> (i32, i32, i32) {
    %c0_i32 = arith.constant 0 : i32
    %c0_i32_0 = arith.constant 0 : i32
    %c0_i32_1 = arith.constant 0 : i32
    %c0_i32_2 = arith.constant 0 : i32
    return %c0_i32, %c0_i32_0, %c0_i32_1 : i32, i32, i32
  }
  func.func @transform_2(%arg0: i32) -> (i32, i32) {
    %c0_i32 = arith.constant 0 : i32
    %c0_i32_0 = arith.constant 0 : i32
    %c0_i32_1 = arith.constant 0 : i32
    return %c0_i32, %c0_i32_0 : i32, i32
  }
  func.func @transform_3(%arg0: i32) -> (i32, i32) {
    %c0_i32 = arith.constant 0 : i32
    %c0_i32_0 = arith.constant 0 : i32
    %c0_i32_1 = arith.constant 0 : i32
    return %c0_i32, %c0_i32_0 : i32, i32
  }
  func.func @transform_4(%arg0: i32) -> (i32, i32) {
    %c0_i32 = arith.constant 0 : i32
    %c0_i32_0 = arith.constant 0 : i32
    %c0_i32_1 = arith.constant 0 : i32
    return %c0_i32, %c0_i32_0 : i32, i32
  }
}

</mosaic_0001>

<bundles_post_ra>
// kernel: tpu_custom_call.1
= control target key start
LH: loop header
LB: loop body
LE: loop exit
PB: predicated region body
PF: predicated region fallthrough
CT: control target
= control target key end

     0   :  { %9 = vsyncpa [#allocation4], 0  ;;  %s1394_s0 = inlined_call_operand.hbm [shape: f32[48,64], index: 0, kind: input, shape index: {}]   ;;  %s1395_s1 = inlined_call_operand.hbm [shape: f32[3,64,128], index: 1, kind: input, shape index: {}]   ;;  %s1396_s2 = inlined_call_operand.vmem [shape: f32[1,8], index: 2, kind: input, shape index: {}]   ;;  %s1397_s3 = inlined_call_operand.vmem [shape: f32[1,8], index: 3, kind: input, shape index: {}]   ;;  %s1398_s4 = inlined_call_operand.hbm [shape: f32[32,128], index: 4, kind: output, shape index: {}]  }
   0x1   :  { %10 = vsyncpa [#allocation7], 0 }
   0x2   :  { %11 = vsyncpa [#allocation5], 0  ;;  %s1154_s15 = smov [#allocation3]   ;;  %s1082_s19 = scalar_lea.hbm %s1394_s0, 768 }
   0x3   :  { %s17_s16 = sshll.u32 %s1154_s15, 4  ;;  %p1083_p0 = scmp.ne.s32.totalorder %s1394_s0, %s1082_s19  ;;  %s18_s16 = int_to_ptr.vmem [resolvable:$true] %s17_s16 }
   0x4   :  { %p1086_p1 = scmp.lt.u32.totalorder %s1082_s19, %s1394_s0 }
   0x6   :  { %p1088_p2 = pnand %p1086_p1, %p1083_p0 }
   0x8   :  { %1091 = shalt.err (!%p1088_p2)
}
   0x9   :  { %s1092_s24 = scalar_lea.vmem %s18_s16, 768  ;;  %p1097_p4 = scmp.lt.s32.totalorder %s18_s16, %s18_s16 }
   0xa   :  { %p1093_p3 = scmp.ne.s32.totalorder %s18_s16, %s1092_s24  ;;  %p1098_p5 = scmp.lt.s32.totalorder %s1092_s24, %s1092_s24 }
   0xc   :  { %p1099_p6 = por %p1098_p5, %p1097_p4 }
   0xe   :  { %p1100_p7 = pnand %p1099_p6, %p1093_p3 }
  0x10   :  { %1103 = shalt.err (!%p1100_p7)
}
  0x11   :  { %s1155_s25 = smov 128   ;;  %s1156_s26 = smov 8  }
  0x12   :  { %23 = dma.hbm_to_vmem [thread:$0]  %s1394_s0, 768, %s18_s16, [#allocation4], %s1155_s25, %s1155_s25, %s1156_s26  }
  0x13   :  { %s1157_s29 = smov [#allocation6]   ;;  %s1104_s7 = scalar_lea.hbm %s1395_s1, 3072 }
  0x14   :  { %s29_s30 = sshll.u32 %s1157_s29, 4  ;;  %p1105_p8 = scmp.ne.s32.totalorder %s1395_s1, %s1104_s7  ;;  %s30_s30 = int_to_ptr.vmem [resolvable:$true] %s29_s30 }
  0x15   :  { %p1108_p9 = scmp.lt.u32.totalorder %s1104_s7, %s1395_s1 }
  0x17   :  { %p1110_p10 = pnand %p1108_p9, %p1105_p8 }
  0x19   :  { %1113 = shalt.err (!%p1110_p10)
}
  0x1a   :  { %s1114_s12 = scalar_lea.vmem %s30_s30, 3072  ;;  %p1119_p12 = scmp.lt.s32.totalorder %s30_s30, %s30_s30 }
  0x1b   :  { %p1115_p11 = scmp.ne.s32.totalorder %s30_s30, %s1114_s12  ;;  %p1120_p13 = scmp.lt.s32.totalorder %s1114_s12, %s1114_s12 }
  0x1d   :  { %p1121_p0 = por %p1120_p13, %p1119_p12 }
  0x1f   :  { %p1122_p1 = pnand %p1121_p0, %p1115_p11 }
  0x21   :  { %1125 = shalt.err (!%p1122_p1)
}
  0x22   :  { %35 = dma.hbm_to_vmem [thread:$0]  %s1395_s1, 3072, %s30_s30, [#allocation7], %s1155_s25, %s1155_s25, %s1156_s26  }
  0x23   :  { %1148 = dma.done.wait [#allocation4], 768  }
  0x24   :  { %1149 = vsyncadd [#allocation4], 4294966528 }
  0x25   :  { %1150 = dma.done.wait [#allocation7], 3072  }
  0x26   :  { %1151 = vsyncadd [#allocation7], 4294964224  ;;  %v71_v0 = vlaneseq  ;;  %v57_v1 = vld [vmem:[#allocation6] sm:$0xff]  ;;  %v58_v2 = vld [vmem:[#allocation6 + $0x8] sm:$0xff]  ;;  %vm87_vm0 = vcmask 523264   ;;  %s1158_s1 = smov 104  }
  0x27   :  { %v59_v3 = vld [vmem:[#allocation6 + $0x10] sm:$0xff]  ;;  %v1018_v5 = vpack.c.bf16 %v58_v2, %v57_v1  ;;  %v60_v6 = vld [vmem:[#allocation6 + $0x18] sm:$0xff]  ;;  %v61_v8 = vld [vmem:[#allocation6 + $0x20] sm:$0xff]  ;;  %s1159_s14 = smov 120   ;;  %s1160_s15 = smov 96   ;;  %vm1172_vm4 = vmmov 0  }
  0x28   :  { %v1232_v4 = vshrl.u32 %v71_v0, 7  ;;  %v1022_v7 = vpack.c.bf16 %v60_v6, %v59_v3  ;;  %v62_v9 = vld [vmem:[#allocation6 + $0x28] sm:$0xff]  ;;  %v79_v10 = vld [vmem:[#allocation6 + $0x40] sm:$0xff]  ;;  %v1234_v12 = vld [vmem:[#allocation3] sm:$0xff]  ;;  %s1161_s16 = smov 112   ;;  %s1162_s17 = smov 80  }
  0x29   :  { %1019 = vmatprep.subr.bf16.mxu0 %v1018_v5  ;;  %v80_v11 = vld [vmem:[#allocation6 + $0x48] sm:$0xff]  ;;  %v65_v14 = vrot.slane %v1234_v12, 1  ;;  %959 = vmatprep.mubr.msk.f32.mxu0 %vm87_vm0, %v1234_v12  ;;  %v1239_v15 = vld [vmem:[#allocation3 + $0x8] sm:$0xff]  ;;  %v81_v16 = vld [vmem:[#allocation6 + $0x50] sm:$0xff]  ;;  %v1026_v17 = vpack.c.bf16 %v62_v9, %v61_v8  ;;  %v282_v43 = vrot.slane %v1234_v12, 2  ;;  %s1163_s18 = smov 88  }
  0x2a   :  { %1021 = vmatpush3.bf16.msra.mxu0 %v1018_v5  ;;  %v1002_v13 = vpack.c.bf16 %v80_v11, %v79_v10  ;;  %vm73_vm1 = vcmp.lt.s32.totalorder %v1232_v4, 7  ;;  %v63_v18 = vld [vmem:[#allocation6 + $0x30] sm:$0xff]  ;;  %v82_v19 = vld [vmem:[#allocation6 + $0x58] sm:$0xff]  ;;  %v66_v20 = vrot.slane %v1239_v15, 1  ;;  %v83_v23 = vld [vmem:[#allocation6 + $0x60] sm:$0xff]  ;;  %v283_v44 = vrot.slane %v1239_v15, 2 }
  0x2b   :  { %1023 = vmatprep.subr.bf16.mxu0 %v1022_v7  ;;  %v64_v21 = vld [vmem:[#allocation6 + $0x38] sm:$0xff]  ;;  %v1006_v22 = vpack.c.bf16 %v82_v19, %v81_v16  ;;  %v84_v24 = vld [vmem:[#allocation6 + $0x68] sm:$0xff]  ;;  %v85_v28 = vld [vmem:[#allocation6 + $0x70] sm:$0xff]  ;;  %vm288_vm2 = vcmp.lt.s32.totalorder %v1232_v4, 6  ;;  %s1164_s19 = smov 64   ;;  %s1165_s20 = smov 72  }
  0x2c   :  { %1003 = vmatprep.subr.bf16.mxu1 %v1002_v13  ;;  %v77_v25 = vsel %vm73_vm1, %v65_v14, %v66_v20  ;;  %v1010_v26 = vpack.c.bf16 %v84_v24, %v83_v23  ;;  %v1030_v27 = vpack.c.bf16 %v64_v21, %v63_v18  ;;  %v86_v29 = vld [vmem:[#allocation6 + $0x78] sm:$0xff]  ;;  %v294_v30 = vld [vmem:[#allocation6 + $0x80] sm:$0xff]  ;;  %v295_v31 = vld [vmem:[#allocation6 + $0x88] sm:$0xff]  ;;  %v292_v52 = vsel %vm288_vm2, %v282_v43, %v283_v44  ;;  %s1167_s21 = smov 48   ;;  %s1168_s22 = smov 56  }
  0x2d   :  { %1005 = vmatpush3.bf16.msra.mxu1 %v1002_v13  ;;  %937 = vmatprep.mubr.msk.f32.mxu1 %vm87_vm0, %v77_v25  ;;  %v1014_v32 = vpack.c.bf16 %v86_v29, %v85_v28  ;;  %v53_v33 = vld [vmem:[#allocation3 + $0x10] sm:$0xff]  ;;  %v1034_v34 = vpack.c.bf16 %v295_v31, %v294_v30  ;;  %v296_v35 = vld [vmem:[#allocation6 + $0x90] sm:$0xff]  ;;  %v297_v36 = vld [vmem:[#allocation6 + $0x98] sm:$0xff]  ;;  %v489_v23 = vand.u32 127, %v71_v0  ;;  %v1166_v24 = vmov 0.0   ;;  %s1170_s23 = smov 32  }
  0x2e   :  { %1025 = vmatpush3.bf16.msra.mxu0 %v1022_v7  ;;  %1007 = vmatprep.subr.bf16.mxu1 %v1006_v22  ;;  %v54_v37 = vld [vmem:[#allocation3 + $0x18] sm:$0xff]  ;;  %v55_v38 = vld [vmem:[#allocation3 + $0x20] sm:$0xff]  ;;  %v67_v39 = vrot.slane %v53_v33, 1  ;;  %v56_v42 = vld [vmem:[#allocation3 + $0x28] sm:$0xff]  ;;  %v1038_v45 = vpack.c.bf16 %v297_v36, %v296_v35  ;;  %v284_v57 = vrot.slane %v53_v33, 2  ;;  %s1171_s24 = smov 40  }
  0x2f   :  { %1027 = vmatprep.subr.bf16.mxu0 %v1026_v17  ;;  %v68_v40 = vrot.slane %v54_v37, 1  ;;  %v69_v41 = vrot.slane %v55_v38, 1  ;;  %v298_v46 = vld [vmem:[#allocation6 + $0xa0] sm:$0xff]  ;;  %v299_v47 = vld [vmem:[#allocation6 + $0xa8] sm:$0xff]  ;;  %v70_v49 = vrot.slane %v56_v42, 1  ;;  %v300_v53 = vld [vmem:[#allocation6 + $0xb0] sm:$0xff] }
  0x30   :  { %v76_v48 = vsel %vm73_vm1, %v66_v20, %v67_v39  ;;  %v1042_v51 = vpack.c.bf16 %v299_v47, %v298_v46  ;;  %v301_v54 = vld [vmem:[#allocation6 + $0xb8] sm:$0xff]  ;;  %v285_v58 = vrot.slane %v54_v37, 2  ;;  %v286_v59 = vrot.slane %v55_v38, 2  ;;  %s1173_s27 = smov 16   ;;  %s1174_s28 = smov 24  }
  0x31   :  { %1009 = vmatpush3.bf16.msra.mxu1 %v1006_v22  ;;  %v75_v50 = vsel %vm73_vm1, %v68_v40, %v69_v41  ;;  %v74_v55 = vsel %vm73_vm1, %v69_v41, %v70_v49  ;;  %v1046_v56 = vpack.c.bf16 %v301_v54, %v300_v53  ;;  %v291_v60 = vsel %vm288_vm2, %v283_v44, %v284_v57 }
  0x32   :  { %1029 = vmatpush3.bf16.msra.mxu0 %v1026_v17  ;;  %1011 = vmatprep.subr.bf16.mxu1 %v1010_v26  ;;  %v287_v61 = vrot.slane %v56_v42, 2  ;;  %v290_v62 = vsel %vm288_vm2, %v285_v58, %v286_v59  ;;  %v494_v25 = vand.u32 7, %v489_v23  ;;  %vm505_vm5 = vcmask 64512  }
  0x33   :  { %1031 = vmatprep.subr.bf16.mxu0 %v1030_v27  ;;  %v1322_v58 = vsub.s32 0, %v1232_v4 }
  0x34   :  { %v289_v63 = vsel %vm288_vm2, %v286_v59, %v287_v61  ;;  %vm1299_vm3 = vcmp.eq.s32.totalorder %v494_v25, %v1232_v4 }
  0x35   :  { %1013 = vmatpush3.bf16.msra.mxu1 %v1010_v26 }
  0x36   :  { %1033 = vmatpush3.bf16.msra.mxu0 %v1030_v27  ;;  %1015 = vmatprep.subr.bf16.mxu1 %v1014_v32  ;;  %v1169_v27 = vmov 1.0  }
  0x37   :  { %1035 = vmatprep.subr.bf16.mxu0 %v1034_v34 }
  0x39   :  { %960 = vmatmul.mubr.msk.f32.vlgmr.msra.gmra.mrb[0].mxu0 %vm87_vm0, %v1239_v15  ;;  %1017 = vmatpush3.bf16.msra.mxu1 %v1014_v32 }
  0x3a   :  { %1037 = vmatpush3.bf16.msra.mxu0 %v1034_v34  ;;  %962 = vmatprep.mubr.msk.f32.mxu0 %vm87_vm0, %v54_v37 }
  0x3b   :  { %1039 = vmatprep.subr.bf16.mxu0 %v1038_v45  ;;  %987 = vmatprep.subr.mxu1 %v1166_v24 }
  0x3c   :  { %938 = vmatmul.mubr.msk.f32.vlgmr.msra.gmra.mrb[0].mxu1 %vm87_vm0, %v76_v48 }
  0x3d   :  { %963 = vmatmul.mubr.msk.f32.gmra.mrb[2].mxu0 %vm87_vm0, %v55_v38  ;;  %940 = vmatprep.mubr.msk.f32.mxu1 %vm87_vm0, %v75_v50 }
  0x3e   :  { %1041 = vmatpush3.bf16.msra.mxu0 %v1038_v45  ;;  %981 = vmatprep.mubr.msk.f32.mxu0 %vm87_vm0, %v292_v52 }
  0x3f   :  { %1043 = vmatprep.subr.bf16.mxu0 %v1042_v51  ;;  %988 = vmatpush3.msk.msra.mxu1 %vm1299_vm3, %v1169_v27 }
  0x40   :  { %941 = vmatmul.mubr.msk.f32.gmra.mrb[2].mxu1 %vm87_vm0, %v74_v55  ;;  %992 = vmatprep.subr.mxu1 %v1166_v24 }
  0x41   :  { %989 = vmatprep.mubr.msk.f32.mxu1 %vm1172_vm4, %v1166_v24 }
  0x42   :  { %1045 = vmatpush3.bf16.msra.mxu0 %v1042_v51 }
  0x43   :  { %1047 = vmatprep.subr.bf16.mxu0 %v1046_v56 }
  0x46   :  { %1049 = vmatpush3.bf16.msra.mxu0 %v1046_v56 }
  0x49   :  { %982 = vmatmul.mubr.msk.f32.vlgmr.msra.gmra.mrb[0].mxu0 %vm87_vm0, %v291_v60 }
  0x4a   :  { %984 = vmatprep.mubr.msk.f32.mxu0 %vm87_vm0, %v290_v62 }
  0x4d   :  { %985 = vmatmul.mubr.msk.f32.gmra.mrb[2].mxu0 %vm87_vm0, %v289_v63 }
 0x10f   :  { %v939_v1 = vpop.f32.mrb[0].mxu1 }
 0x110   :  { %v166_v2 = vpop.f32.mrb[1].mxu1 }
 0x113   :  { %v942_v3 = vpop.f32.mrb[2].mxu1 }
 0x114   :  { %v176_v5 = vpop.f32.mrb[3].mxu1 }
 0x11c   :  { %v983_v6 = vpop.f32.mrb[0].mxu0 }
 0x11d   :  { %v1274_v7 = vadd.f32 %v983_v6, %v939_v1  ;;  %v380_v8 = vpop.f32.mrb[1].mxu0 }
 0x11e   :  { %v1276_v9 = vadd.f32 %v380_v8, %v166_v2 }
 0x120   :  { %v986_v10 = vpop.f32.mrb[2].mxu0  ;;  %v409_v13 = vadd.f32 %v1276_v9, %v1274_v7 }
 0x121   :  { %v1278_v11 = vadd.f32 %v986_v10, %v942_v3  ;;  %v390_v12 = vpop.f32.mrb[3].mxu0 }
 0x122   :  { %v1282_v14 = vadd.f32 %v390_v12, %v176_v5 }
 0x124   :  { %v410_v15 = vadd.f32 %v1282_v14, %v409_v13 }
 0x126   :  { %v411_v16 = vadd.f32 %v1278_v11, %v410_v15 }
 0x128   :  { %v419_v17 = vrot.slane %v411_v16, 4 }
 0x12a   :  { %v420_v18 = vadd.f32 %v419_v17, %v411_v16 }
 0x12c   :  { %v421_v19 = vrot.slane %v420_v18, 2 }
 0x12e   :  { %v422_v20 = vadd.f32 %v421_v19, %v420_v18 }
 0x130   :  { %v423_v21 = vrot.slane %v422_v20, 1 }
 0x132   :  { %v424_v22 = vadd.f32 %v423_v21, %v422_v20 }
 0x134   :  { %434 = vrot.lane.b32.xlu1 %v424_v22, %s1158_s1  ;;  %426 = vrot.lane.b32.xlu0 %v424_v22, %s1159_s14 }
 0x138   :  { %438 = vrot.lane.b32.xlu1 %v424_v22, %s1160_s15  ;;  %430 = vrot.lane.b32.xlu0 %v424_v22, %s1161_s16 }
 0x13c   :  { %446 = vrot.lane.b32.xlu1 %v424_v22, %s1162_s17  ;;  %442 = vrot.lane.b32.xlu0 %v424_v22, %s1163_s18 }
 0x140   :  { %454 = vrot.lane.b32.xlu1 %v424_v22, %s1164_s19  ;;  %450 = vrot.lane.b32.xlu0 %v424_v22, %s1165_s20 }
 0x144   :  { %462 = vrot.lane.b32.xlu1 %v424_v22, %s1167_s21  ;;  %458 = vrot.lane.b32.xlu0 %v424_v22, %s1168_s22 }
 0x148   :  { %470 = vrot.lane.b32.xlu1 %v424_v22, %s1170_s23  ;;  %466 = vrot.lane.b32.xlu0 %v424_v22, %s1171_s24 }
 0x14c   :  { %478 = vrot.lane.b32.xlu1 %v424_v22, %s1173_s27  ;;  %474 = vrot.lane.b32.xlu0 %v424_v22, %s1174_s28 }
 0x150   :  { %482 = vrot.lane.b32.xlu0 %v424_v22, %s1156_s26 }
 0x1a6   :  { %v435_v0 = vpop.permute.xlu1 %434  ;;  %v427_v28 = vpop.permute.xlu0 %426 }
 0x1a7   :  { %v429_v29 = vadd.f32 %v427_v28, %v424_v22 }
 0x1aa   :  { %v439_v30 = vpop.permute.xlu1 %438  ;;  %v431_v31 = vpop.permute.xlu0 %430 }
 0x1ab   :  { %v433_v32 = vadd.f32 %v431_v31, %v429_v29 }
 0x1ad   :  { %v437_v33 = vadd.f32 %v435_v0, %v433_v32 }
 0x1ae   :  { %v447_v34 = vpop.permute.xlu1 %446  ;;  %v443_v35 = vpop.permute.xlu0 %442 }
 0x1af   :  { %v441_v36 = vadd.f32 %v439_v30, %v437_v33 }
 0x1b1   :  { %v445_v37 = vadd.f32 %v443_v35, %v441_v36 }
 0x1b2   :  { %v455_v38 = vpop.permute.xlu1 %454  ;;  %v451_v39 = vpop.permute.xlu0 %450 }
 0x1b3   :  { %v449_v40 = vadd.f32 %v447_v34, %v445_v37 }
 0x1b5   :  { %v453_v41 = vadd.f32 %v451_v39, %v449_v40 }
 0x1b6   :  { %v463_v42 = vpop.permute.xlu1 %462  ;;  %v459_v43 = vpop.permute.xlu0 %458 }
 0x1b7   :  { %v457_v44 = vadd.f32 %v455_v38, %v453_v41 }
 0x1b9   :  { %v461_v45 = vadd.f32 %v459_v43, %v457_v44 }
 0x1ba   :  { %v467_v46 = vpop.permute.xlu0 %466  ;;  %v471_v48 = vpop.permute.xlu1 %470 }
 0x1bb   :  { %v465_v47 = vadd.f32 %v463_v42, %v461_v45 }
 0x1bd   :  { %v469_v49 = vadd.f32 %v467_v46, %v465_v47 }
 0x1be   :  { %v475_v50 = vpop.permute.xlu0 %474  ;;  %v479_v53 = vpop.permute.xlu1 %478 }
 0x1bf   :  { %v473_v51 = vadd.f32 %v471_v48, %v469_v49 }
 0x1c1   :  { %v477_v52 = vadd.f32 %v475_v50, %v473_v51  ;;  %v667_v51 = vld [vmem:[%s1396_s2] sm:$0x1]  ;;  %s1175_s2 = smov [#allocation8]  }
 0x1c2   :  { %v483_v55 = vpop.permute.xlu0 %482 }
 0x1c3   :  { %v481_v54 = vadd.f32 %v479_v53, %v477_v52 }
 0x1c5   :  { %v485_v56 = vadd.f32 %v483_v55, %v481_v54  ;;  %v744_v54 = vld [vmem:[%s1397_s3] sm:$0x1]  ;;  %s847_s3 = sshll.u32 %s1175_s2, 4  ;;  %s848_s3 = int_to_ptr.vmem [resolvable:$true] %s847_s3 }
 0x1c6   :  { %s1126_s7 = scalar_lea.vmem %s848_s3, 512  ;;  %p1131_p3 = scmp.lt.s32.totalorder %s848_s3, %s848_s3 }
 0x1c7   :  { %v487_v57 = vmul.f32 0.001953125, %v485_v56  ;;  %p1127_p2 = scmp.ne.s32.totalorder %s848_s3, %s1126_s7  ;;  %p1132_p4 = scmp.lt.s32.totalorder %s1126_s7, %s1126_s7 }
 0x1c9   :  { %990 = vmatmul.mubr.msk.f32.vlgmr.msra.gmra.mrb[4].mxu1 %vm505_vm5, %v487_v57  ;;  %p1133_p5 = por %p1132_p4, %p1131_p3 }
 0x1ca   :  { %993 = vmatpush3.msk.msra.mxu1 %vm1299_vm3, %v1169_v27  ;;  %994 = vmatprep.mubr.msk.f32.mxu1 %vm1172_vm4, %v1166_v24 }
 0x1cb   :  { %997 = vmatprep.subr.mxu1 %v1166_v24  ;;  %p1134_p6 = pnand %p1133_p5, %p1127_p2 }
 0x29c   :  { %v575_v59 = vpop.f32.mrb[4].mxu1 }
 0x29d   :  { %v586_v60 = vrot.slane %v575_v59, %v1322_v58  ;;  %v991_v61 = vpop.f32.mrb[5].mxu1 }
 0x29f   :  { %v1326_v62 = vsub.f32 %v1276_v9, %v586_v60  ;;  %v1329_v63 = vsub.f32 %v1274_v7, %v586_v60  ;;  %v1332_v1 = vsub.f32 %v1282_v14, %v586_v60  ;;  %v1335_v2 = vsub.f32 %v1278_v11, %v586_v60 }
 0x2a1   :  { %v591_v4 = vmul.f32 %v1326_v62, %v1326_v62  ;;  %v592_v3 = vmul.f32 %v1329_v63, %v1329_v63  ;;  %v593_v5 = vmul.f32 %v1332_v1, %v1332_v1  ;;  %v594_v7 = vmul.f32 %v1335_v2, %v1335_v2 }
 0x2a3   :  { %v595_v6 = vadd.f32 %v592_v3, %v591_v4 }
 0x2a5   :  { %v596_v8 = vadd.f32 %v595_v6, %v593_v5 }
 0x2a7   :  { %v597_v9 = vadd.f32 %v596_v8, %v594_v7 }
 0x2a9   :  { %v598_v10 = vrot.slane %v597_v9, 4 }
 0x2ab   :  { %v599_v12 = vadd.f32 %v598_v10, %v597_v9 }
 0x2ad   :  { %v600_v13 = vrot.slane %v599_v12, 2 }
 0x2af   :  { %v601_v11 = vadd.f32 %v600_v13, %v599_v12 }
 0x2b1   :  { %v602_v14 = vrot.slane %v601_v11, 1 }
 0x2b3   :  { %v603_v15 = vadd.f32 %v602_v14, %v601_v11 }
 0x2b5   :  { %609 = vrot.lane.b32.xlu0 %v603_v15, %s1161_s16  ;;  %605 = vrot.lane.b32.xlu1 %v603_v15, %s1159_s14 }
 0x2b9   :  { %617 = vrot.lane.b32.xlu0 %v603_v15, %s1160_s15  ;;  %613 = vrot.lane.b32.xlu1 %v603_v15, %s1158_s1 }
 0x2bd   :  { %625 = vrot.lane.b32.xlu0 %v603_v15, %s1162_s17  ;;  %621 = vrot.lane.b32.xlu1 %v603_v15, %s1163_s18 }
 0x2c1   :  { %633 = vrot.lane.b32.xlu0 %v603_v15, %s1164_s19  ;;  %629 = vrot.lane.b32.xlu1 %v603_v15, %s1165_s20 }
 0x2c5   :  { %641 = vrot.lane.b32.xlu0 %v603_v15, %s1167_s21  ;;  %637 = vrot.lane.b32.xlu1 %v603_v15, %s1168_s22 }
 0x2c9   :  { %649 = vrot.lane.b32.xlu0 %v603_v15, %s1170_s23  ;;  %645 = vrot.lane.b32.xlu1 %v603_v15, %s1171_s24 }
 0x2cd   :  { %657 = vrot.lane.b32.xlu0 %v603_v15, %s1173_s27  ;;  %653 = vrot.lane.b32.xlu1 %v603_v15, %s1174_s28 }
 0x2d1   :  { %661 = vrot.lane.b32.xlu1 %v603_v15, %s1156_s26 }
 0x327   :  { %v610_v16 = vpop.permute.xlu0 %609  ;;  %v606_v17 = vpop.permute.xlu1 %605 }
 0x328   :  { %v608_v18 = vadd.f32 %v606_v17, %v603_v15 }
 0x32a   :  { %v612_v19 = vadd.f32 %v610_v16, %v608_v18 }
 0x32b   :  { %v618_v20 = vpop.permute.xlu0 %617  ;;  %v614_v21 = vpop.permute.xlu1 %613 }
 0x32c   :  { %v616_v22 = vadd.f32 %v614_v21, %v612_v19 }
 0x32e   :  { %v620_v23 = vadd.f32 %v618_v20, %v616_v22 }
 0x32f   :  { %v626_v25 = vpop.permute.xlu0 %625  ;;  %v622_v0 = vpop.permute.xlu1 %621 }
 0x330   :  { %v624_v28 = vadd.f32 %v622_v0, %v620_v23 }
 0x332   :  { %v628_v29 = vadd.f32 %v626_v25, %v624_v28 }
 0x333   :  { %v634_v30 = vpop.permute.xlu0 %633  ;;  %v630_v31 = vpop.permute.xlu1 %629 }
 0x334   :  { %v632_v32 = vadd.f32 %v630_v31, %v628_v29 }
 0x336   :  { %v636_v33 = vadd.f32 %v634_v30, %v632_v32 }
 0x337   :  { %v642_v34 = vpop.permute.xlu0 %641  ;;  %v638_v35 = vpop.permute.xlu1 %637 }
 0x338   :  { %v640_v36 = vadd.f32 %v638_v35, %v636_v33 }
 0x33a   :  { %v644_v37 = vadd.f32 %v642_v34, %v640_v36 }
 0x33b   :  { %v650_v38 = vpop.permute.xlu0 %649  ;;  %v646_v39 = vpop.permute.xlu1 %645 }
 0x33c   :  { %v648_v40 = vadd.f32 %v646_v39, %v644_v37 }
 0x33e   :  { %v652_v41 = vadd.f32 %v650_v38, %v648_v40 }
 0x33f   :  { %v654_v42 = vpop.permute.xlu1 %653  ;;  %v658_v44 = vpop.permute.xlu0 %657 }
 0x340   :  { %v656_v43 = vadd.f32 %v654_v42, %v652_v41 }
 0x342   :  { %v660_v45 = vadd.f32 %v658_v44, %v656_v43 }
 0x343   :  { %v662_v46 = vpop.permute.xlu1 %661 }
 0x344   :  { %v664_v47 = vadd.f32 %v662_v46, %v660_v45 }
 0x346   :  { %v665_v48 = vmul.f32 0.001953125, %v664_v47 }
 0x348   :  { %v666_v49 = vmax.f32 %v665_v48, 0.0 }
 0x34a   :  { %v668_v50 = vadd.f32 1e-05, %v666_v49 }
 0x34c   :  { %1080 = vrsqrt.f32 %v668_v50 }
 0x356   :  { %v1081_v52 = vpop.eup %1080 }
 0x357   :  { %v670_v53 = vmul.f32 %v1081_v52, %v667_v51 }
 0x359   :  { %995 = vmatmul.mubr.msk.f32.vlgmr.msra.gmra.mrb[6].mxu1 %vm505_vm5, %v670_v53 }
 0x35a   :  { %998 = vmatpush3.msk.msra.mxu1 %vm1299_vm3, %v1169_v27  ;;  %999 = vmatprep.mubr.msk.f32.mxu1 %vm1172_vm4, %v1166_v24 }
 0x35d   :  { %1000 = vmatmul.mubr.msk.f32.vlgmr.msra.gmra.mrb[8].mxu1 %vm505_vm5, %v744_v54 }
 0x42c   :  { %v740_v55 = vpop.f32.mrb[6].mxu1 }
 0x42d   :  { %v821_v56 = vrot.slane %v740_v55, %v1322_v58  ;;  %v996_v57 = vpop.f32.mrb[7].mxu1 }
 0x42f   :  { %v822_v59 = vmul.f32 %v821_v56, %v1326_v62  ;;  %v823_v61 = vmul.f32 %v821_v56, %v1329_v63  ;;  %v824_v26 = vmul.f32 %v821_v56, %v1332_v1  ;;  %v825_v27 = vmul.f32 %v821_v56, %v1335_v2 }
 0x430   :  { %v814_v60 = vpop.f32.mrb[8].mxu1 }
 0x431   :  { %v829_v24 = vrot.slane %v814_v60, %v1322_v58  ;;  %v1001_v4 = vpop.f32.mrb[9].mxu1 }
 0x433   :  { %v830_v3 = vadd.f32 %v829_v24, %v822_v59  ;;  %v831_v5 = vadd.f32 %v829_v24, %v823_v61  ;;  %v832_v6 = vadd.f32 %v829_v24, %v824_v26  ;;  %v833_v7 = vadd.f32 %v829_v24, %v825_v27 }
 0x435   :  { %v834_v8 = vmax.f32 %v830_v3, 0.0  ;;  %v835_v9 = vmax.f32 %v831_v5, 0.0  ;;  %v836_v10 = vmax.f32 %v832_v6, 0.0  ;;  %v837_v62 = vmax.f32 %v833_v7, 0.0 }
 0x437   :  { %838 = vst [vmem:[#allocation8] sm:$0xff] %v834_v8  ;;  %839 = vst [vmem:[#allocation8 + $0x8] sm:$0xff] %v835_v9 }
 0x438   :  { %840 = vst [vmem:[#allocation8 + $0x10] sm:$0xff] %v836_v10  ;;  %841 = vst [vmem:[#allocation8 + $0x18] sm:$0xff] %v837_v62 }
 0x439   :  { %1137 = shalt.err (!%p1134_p6)
}
 0x43a   :  { %s1138_s10 = scalar_lea.hbm %s1398_s4, 512 }
 0x43b   :  { %p1139_p7 = scmp.ne.s32.totalorder %s1398_s4, %s1138_s10  ;;  %p1142_p8 = scmp.lt.u32.totalorder %s1138_s10, %s1398_s4 }
 0x43d   :  { %p1144_p9 = pnand %p1142_p8, %p1139_p7 }
 0x43f   :  { %1147 = shalt.err (!%p1144_p9)
}
 0x440   :  { %853 = dma.vmem_to_hbm [thread:$0]  %s848_s3, 512, %s1398_s4, [#allocation5], %s1155_s25, %s1155_s25, %s1156_s26  }
 0x441   :  { %1152 = dma.done.wait [#allocation5], 512  }
 0x442   :  { %1153 = vsyncadd [#allocation5], 4294966784 }
 0x443   :  { %857 = vsyncpa [#allocation4], 1 }
 0x444   :  { %858 = vsyncpa [#allocation7], 1 }
 0x445   :  { %859 = vsyncpa [#allocation5], 1 }

</bundles_post_ra>
